<compile_context>
chip_gen: v7x
topology: tpu7x:2x2x1
jax: 0.10.0
libtpu: 0.0.40
codegen_flags: <defaults>
</compile_context>

<pallas_src>
import jax
import jax.numpy as jnp
from jax.experimental import pallas as pl
from jax.experimental.pallas import tpu as pltpu


def _round_up(n, m):
    return ((n + m - 1) // m) * m


def _make_dbn_kernel(n_layers):
    """Fused kernel over `n_layers` chained RBM to_hidden steps."""

    def kernel(*refs):
        # refs layout: x_ref, [w_ref, b_ref, u_ref] * n_layers, prob_ref, samp_ref
        x_ref = refs[0]
        prob_ref = refs[1 + 3 * n_layers]
        samp_ref = refs[2 + 3 * n_layers]

        v = x_ref[...]                              # bf16 (TM, Vpad)
        p = None
        s = None
        for i in range(n_layers):
            w_ref = refs[1 + 3 * i]                 # bf16 (prev_pad, Hpad)
            b_ref = refs[2 + 3 * i]                 # f32  (1, Hpad)
            u_ref = refs[3 + 3 * i]                 # f32  (TM, Hpad) uniforms in [0,1)

            # MXU matmul, bf16 operands, f32 accumulation.
            logits = jnp.dot(v, w_ref[...], preferred_element_type=jnp.float32)
            logits = logits + b_ref[...]            # bias broadcasts over batch tile
            p = jax.nn.sigmoid(logits)              # f32, EUP
            s = u_ref[...] < p                      # Bernoulli sample (bool)
            v = s.astype(jnp.bfloat16)              # feed next layer's MXU

        prob_ref[...] = p.astype(prob_ref.dtype)
        samp_ref[...] = s.astype(samp_ref.dtype)

    return kernel


def dbn_forward_pallas(x, weights, h_biases, key, *, max_batch_tile=256):
    """Fused DBN forward: returns (prob_last, sample_last), matching DBN.forward."""
    n_layers = len(weights)
    assert n_layers >= 1

    B = x.shape[0]
    x2d = x.reshape(B, -1).astype(jnp.float32)
    V = x2d.shape[1]

    # Batch tiling: pad batch to a multiple of the tile (tile itself a multiple of 8).
    Bpad = _round_up(max(B, 8), 8)
    TM = min(max_batch_tile, Bpad)
    Bpad = _round_up(Bpad, TM)
    # Lane-dense visible dim.
    Vpad = _round_up(V, 128)

    x_p = jnp.zeros((Bpad, Vpad), jnp.bfloat16).at[:B, :V].set(x2d.astype(jnp.bfloat16))

    in_specs = [pl.BlockSpec((TM, Vpad), lambda i: (i, 0))]
    layer_inputs = []
    h_dims = []
    prev_pad = Vpad
    keys = jax.random.split(key, n_layers)

    for li in range(n_layers):
        W = weights[li]
        b = h_biases[li]
        Vi, Hi = W.shape
        Hpad = _round_up(Hi, 128)
        h_dims.append((Hi, Hpad))

        # Zero-padding the weight rows/cols keeps padded units inert:
        # padded output cols get logits==0 (sliced away / multiplied by zero rows next layer).
        w_p = jnp.zeros((prev_pad, Hpad), jnp.bfloat16).at[:Vi, :Hi].set(
            W.astype(jnp.bfloat16))
        b_p = jnp.zeros((1, Hpad), jnp.float32).at[0, :Hi].set(b.astype(jnp.float32))
        u_p = jax.random.uniform(keys[li], (Bpad, Hpad), dtype=jnp.float32)

        layer_inputs += [w_p, b_p, u_p]
        in_specs += [
            pl.BlockSpec((prev_pad, Hpad), lambda i: (0, 0)),   # weights resident
            pl.BlockSpec((1, Hpad), lambda i: (0, 0)),          # bias resident
            pl.BlockSpec((TM, Hpad), lambda i: (i, 0)),         # uniforms, batch-tiled
        ]
        prev_pad = Hpad

    H_last, Hpad_last = h_dims[-1]
    out_specs = [
        pl.BlockSpec((TM, Hpad_last), lambda i: (i, 0)),
        pl.BlockSpec((TM, Hpad_last), lambda i: (i, 0)),
    ]
    out_shape = (
        jax.ShapeDtypeStruct((Bpad, Hpad_last), jnp.float32),
        jax.ShapeDtypeStruct((Bpad, Hpad_last), jnp.float32),
    )

    prob, samp = pl.pallas_call(
        _make_dbn_kernel(n_layers),
        grid=(Bpad // TM,),
        in_specs=in_specs,
        out_specs=out_specs,
        out_shape=out_shape,
        compiler_params=pltpu.CompilerParams(
            dimension_semantics=("parallel",),
        ),
    )(x_p, *layer_inputs)

    return prob[:B, :H_last], samp[:B, :H_last]


class DBNPallas:
    """Mirror of the PyTorch DBN forward: chained RBM.to_hidden, fused into one kernel."""

    def __init__(self, visible_units=256, hidden_units=(64, 100), key=None):
        if key is None:
            key = jax.random.PRNGKey(0)
        self.Ws = []
        self.h_biases = []
        prev = visible_units
        for h in hidden_units:
            key, wk = jax.random.split(key)
            # PyTorch RBM init (xavier_init=False): W = randn(V, H) * 0.01, biases = 0.
            W = jax.random.normal(wk, (prev, h), dtype=jnp.float32) * 0.01
            self.Ws.append(W)
            self.h_biases.append(jnp.zeros((h,), dtype=jnp.float32))
            prev = h

    def forward(self, input_data, key=None):
        if key is None:
            key = jax.random.PRNGKey(1234)
        return dbn_forward_pallas(input_data, self.Ws, self.h_biases, key)


if __name__ == "__main__":
    key = jax.random.PRNGKey(0)
    key, xkey, skey = jax.random.split(key, 3)

    batch = 8
    visible_units = 256
    hidden_units = (64, 100)

    # Deterministic synthetic input shaped like flattened image data (16x16 = 256 visible).
    x = jax.random.uniform(xkey, (batch, 16, 16), dtype=jnp.float32)

    dbn = DBNPallas(visible_units=visible_units, hidden_units=hidden_units, key=key)
    p_v, v = dbn.forward(x, key=skey)
    jax.block_until_ready((p_v, v))

    assert p_v.shape == (batch, hidden_units[-1])
    assert v.shape == (batch, hidden_units[-1])
    assert bool(jnp.all((p_v >= 0.0) & (p_v <= 1.0)))
    assert bool(jnp.all((v == 0.0) | (v == 1.0)))

    print("KERNEL_OK")
</pallas_src>

<mosaic_0001>
module attributes {stable_mosaic.version = 11 : i64} {
  func.func @kernel(%arg0: i32, %arg1: memref<8x256xbf16, #tpu.memory_space<vmem>>, %arg2: memref<256x128xbf16, #tpu.memory_space<vmem>>, %arg3: memref<1x128xf32, #tpu.memory_space<vmem>>, %arg4: memref<8x128xf32, #tpu.memory_space<vmem>>, %arg5: memref<128x128xbf16, #tpu.memory_space<vmem>>, %arg6: memref<1x128xf32, #tpu.memory_space<vmem>>, %arg7: memref<8x128xf32, #tpu.memory_space<vmem>>, %arg8: memref<8x128xf32, #tpu.memory_space<vmem>>, %arg9: memref<8x128xf32, #tpu.memory_space<vmem>>) attributes {dimension_semantics = [#tpu.dimension_semantics<parallel>], iteration_bounds = array<i64: 1>, scalar_prefetch = 0 : i64, scratch_operands = 0 : i64, tpu.core_type = #tpu.core_type<tc>, window_params = [{transform_indices = @transform_0, window_bounds = array<i64: 8, 256>}, {pipeline_mode = #tpu.pipeline_mode<synchronous>, transform_indices = @transform_1, window_bounds = array<i64: 256, 128>}, {pipeline_mode = #tpu.pipeline_mode<synchronous>, transform_indices = @transform_2, window_bounds = array<i64: 1, 128>}, {transform_indices = @transform_3, window_bounds = array<i64: 8, 128>}, {pipeline_mode = #tpu.pipeline_mode<synchronous>, transform_indices = @transform_4, window_bounds = array<i64: 128, 128>}, {pipeline_mode = #tpu.pipeline_mode<synchronous>, transform_indices = @transform_5, window_bounds = array<i64: 1, 128>}, {transform_indices = @transform_6, window_bounds = array<i64: 8, 128>}, {transform_indices = @transform_7, window_bounds = array<i64: 8, 128>}, {transform_indices = @transform_8, window_bounds = array<i64: 8, 128>}]} {
    %c0 = arith.constant 0 : index
    %c0_0 = arith.constant 0 : index
    %0 = vector.load %arg1[%c0, %c0_0] : memref<8x256xbf16, #tpu.memory_space<vmem>>, vector<8x256xbf16>
    %c0_1 = arith.constant 0 : index
    %c0_2 = arith.constant 0 : index
    %1 = vector.load %arg2[%c0_1, %c0_2] : memref<256x128xbf16, #tpu.memory_space<vmem>>, vector<256x128xbf16>
    %cst = arith.constant dense<0.000000e+00> : vector<8x128xf32>
    %2 = tpu.matmul %0, %1, %cst {dimension_numbers = #tpu.dot_dimension_numbers<[1], [0], [0], [1], [0, 0, 1, 1], [], []>} : vector<8x256xbf16>, vector<256x128xbf16>, vector<8x128xf32> -> vector<8x128xf32>
    %c0_3 = arith.constant 0 : index
    %c0_4 = arith.constant 0 : index
    %3 = vector.load %arg3[%c0_3, %c0_4] : memref<1x128xf32, #tpu.memory_space<vmem>>, vector<1x128xf32>
    %4 = vector.broadcast %3 : vector<1x128xf32> to vector<8x128xf32>
    %5 = arith.addf %2, %4 : vector<8x128xf32>
    %6 = arith.negf %5 : vector<8x128xf32>
    %7 = math.exp %6 : vector<8x128xf32>
    %cst_5 = arith.constant 1.000000e+00 : f32
    %8 = vector.broadcast %cst_5 : f32 to vector<8x128xf32>
    %9 = arith.addf %8, %7 : vector<8x128xf32>
    %10 = arith.divf %8, %9 : vector<8x128xf32>
    %c0_6 = arith.constant 0 : index
    %c0_7 = arith.constant 0 : index
    %11 = vector.load %arg4[%c0_6, %c0_7] : memref<8x128xf32, #tpu.memory_space<vmem>>, vector<8x128xf32>
    %12 = arith.cmpf olt, %11, %10 : vector<8x128xf32>
    %13 = arith.extui %12 : vector<8x128xi1> to vector<8x128xi32>
    %14 = arith.sitofp %13 : vector<8x128xi32> to vector<8x128xf32>
    %15 = arith.truncf %14 : vector<8x128xf32> to vector<8x128xbf16>
    %c0_8 = arith.constant 0 : index
    %c0_9 = arith.constant 0 : index
    %16 = vector.load %arg5[%c0_8, %c0_9] : memref<128x128xbf16, #tpu.memory_space<vmem>>, vector<128x128xbf16>
    %cst_10 = arith.constant dense<0.000000e+00> : vector<8x128xf32>
    %17 = tpu.matmul %15, %16, %cst_10 {dimension_numbers = #tpu.dot_dimension_numbers<[1], [0], [0], [1], [0, 0, 1, 1], [], []>} : vector<8x128xbf16>, vector<128x128xbf16>, vector<8x128xf32> -> vector<8x128xf32>
    %c0_11 = arith.constant 0 : index
    %c0_12 = arith.constant 0 : index
    %18 = vector.load %arg6[%c0_11, %c0_12] : memref<1x128xf32, #tpu.memory_space<vmem>>, vector<1x128xf32>
    %19 = vector.broadcast %18 : vector<1x128xf32> to vector<8x128xf32>
    %20 = arith.addf %17, %19 : vector<8x128xf32>
    %21 = arith.negf %20 : vector<8x128xf32>
    %22 = math.exp %21 : vector<8x128xf32>
    %cst_13 = arith.constant 1.000000e+00 : f32
    %23 = vector.broadcast %cst_13 : f32 to vector<8x128xf32>
    %24 = arith.addf %23, %22 : vector<8x128xf32>
    %25 = arith.divf %23, %24 : vector<8x128xf32>
    %c0_14 = arith.constant 0 : index
    %c0_15 = arith.constant 0 : index
    %26 = vector.load %arg7[%c0_14, %c0_15] : memref<8x128xf32, #tpu.memory_space<vmem>>, vector<8x128xf32>
    %27 = arith.cmpf olt, %26, %25 : vector<8x128xf32>
    %c0_16 = arith.constant 0 : index
    %c0_17 = arith.constant 0 : index
    %28 = vector.load %arg8[%c0_16, %c0_17] : memref<8x128xf32, #tpu.memory_space<vmem>>, vector<8x128xf32>
    tpu.vector_store %arg8[%c0_16, %c0_17], %25 {strides = array<i32>} : memref<8x128xf32, #tpu.memory_space<vmem>>, vector<8x128xf32>,
    %29 = arith.extui %27 : vector<8x128xi1> to vector<8x128xi32>
    %30 = arith.sitofp %29 : vector<8x128xi32> to vector<8x128xf32>
    %c0_18 = arith.constant 0 : index
    %c0_19 = arith.constant 0 : index
    %31 = vector.load %arg9[%c0_18, %c0_19] : memref<8x128xf32, #tpu.memory_space<vmem>>, vector<8x128xf32>
    tpu.vector_store %arg9[%c0_18, %c0_19], %30 {strides = array<i32>} : memref<8x128xf32, #tpu.memory_space<vmem>>, vector<8x128xf32>,
    return
  }
  func.func @transform_0(%arg0: i32) -> (i32, i32) {
    %c0_i32 = arith.constant 0 : i32
    %c0_i32_0 = arith.constant 0 : i32
    return %arg0, %c0_i32 : i32, i32
  }
  func.func @transform_1(%arg0: i32) -> (i32, i32) {
    %c0_i32 = arith.constant 0 : i32
    %c0_i32_0 = arith.constant 0 : i32
    %c0_i32_1 = arith.constant 0 : i32
    return %c0_i32, %c0_i32_0 : i32, i32
  }
  func.func @transform_2(%arg0: i32) -> (i32, i32) {
    %c0_i32 = arith.constant 0 : i32
    %c0_i32_0 = arith.constant 0 : i32
    %c0_i32_1 = arith.constant 0 : i32
    return %c0_i32, %c0_i32_0 : i32, i32
  }
  func.func @transform_3(%arg0: i32) -> (i32, i32) {
    %c0_i32 = arith.constant 0 : i32
    %c0_i32_0 = arith.constant 0 : i32
    return %arg0, %c0_i32 : i32, i32
  }
  func.func @transform_4(%arg0: i32) -> (i32, i32) {
    %c0_i32 = arith.constant 0 : i32
    %c0_i32_0 = arith.constant 0 : i32
    %c0_i32_1 = arith.constant 0 : i32
    return %c0_i32, %c0_i32_0 : i32, i32
  }
  func.func @transform_5(%arg0: i32) -> (i32, i32) {
    %c0_i32 = arith.constant 0 : i32
    %c0_i32_0 = arith.constant 0 : i32
    %c0_i32_1 = arith.constant 0 : i32
    return %c0_i32, %c0_i32_0 : i32, i32
  }
  func.func @transform_6(%arg0: i32) -> (i32, i32) {
    %c0_i32 = arith.constant 0 : i32
    %c0_i32_0 = arith.constant 0 : i32
    return %arg0, %c0_i32 : i32, i32
  }
  func.func @transform_7(%arg0: i32) -> (i32, i32) {
    %c0_i32 = arith.constant 0 : i32
    %c0_i32_0 = arith.constant 0 : i32
    return %arg0, %c0_i32 : i32, i32
  }
  func.func @transform_8(%arg0: i32) -> (i32, i32) {
    %c0_i32 = arith.constant 0 : i32
    %c0_i32_0 = arith.constant 0 : i32
    return %arg0, %c0_i32 : i32, i32
  }
}

</mosaic_0001>

<bundles_post_ra>
// kernel: tpu_custom_call.1
= control target key start
LH: loop header
LB: loop body
LE: loop exit
PB: predicated region body
PF: predicated region fallthrough
CT: control target
= control target key end

     0   :  { %14 = vsyncpa [#allocation3], 0  ;;  %s807_s0 = inlined_call_operand.hbm [shape: bf16[8,256], index: 0, kind: input, shape index: {}]   ;;  %s808_s1 = inlined_call_operand.hbm [shape: bf16[256,128], index: 1, kind: input, shape index: {}]   ;;  %s809_s2 = inlined_call_operand.vmem [shape: f32[1,128], index: 2, kind: input, shape index: {}]   ;;  %s810_s3 = inlined_call_operand.vmem [shape: f32[8,128], index: 3, kind: input, shape index: {}]   ;;  %s811_s4 = inlined_call_operand.hbm [shape: bf16[128,128], index: 4, kind: input, shape index: {}]   ;;  %s812_s5 = inlined_call_operand.vmem [shape: f32[1,128], index: 5, kind: input, shape index: {}]   ;;  %s813_s6 = inlined_call_operand.vmem [shape: f32[8,128], index: 6, kind: input, shape index: {}]   ;;  %s814_s7 = inlined_call_operand.hbm [shape: f32[8,128], index: 7, kind: output, shape index: {0}]   ;;  %s815_s8 = inlined_call_operand.hbm [shape: f32[8,128], index: 8, kind: output, shape index: {1}]  }
   0x1   :  { %15 = vsyncpa [#allocation6], 0 }
   0x2   :  { %16 = vsyncpa [#allocation4], 0 }
   0x3   :  { %17 = vsyncpa [#allocation10], 0  ;;  %s664_s27 = smov [#allocation5]   ;;  %s546_s9 = scalar_lea.hbm %s808_s1, 2048 }
   0x4   :  { %s33_s28 = sshll.u32 %s664_s27, 4  ;;  %p547_p0 = scmp.ne.s32.totalorder %s808_s1, %s546_s9  ;;  %s34_s28 = int_to_ptr.vmem [resolvable:$true] %s33_s28 }
   0x5   :  { %p550_p1 = scmp.lt.u32.totalorder %s546_s9, %s808_s1 }
   0x7   :  { %p552_p2 = pnand %p550_p1, %p547_p0 }
   0x9   :  { %555 = shalt.err (!%p552_p2)
}
   0xa   :  { %s556_s14 = scalar_lea.vmem %s34_s28, 2048  ;;  %p561_p4 = scmp.lt.s32.totalorder %s34_s28, %s34_s28 }
   0xb   :  { %p557_p3 = scmp.ne.s32.totalorder %s34_s28, %s556_s14  ;;  %p562_p5 = scmp.lt.s32.totalorder %s556_s14, %s556_s14 }
   0xd   :  { %p563_p6 = por %p562_p5, %p561_p4 }
   0xf   :  { %p564_p7 = pnand %p563_p6, %p557_p3 }
  0x11   :  { %567 = shalt.err (!%p564_p7)
}
  0x12   :  { %s665_s15 = smov 64   ;;  %s666_s16 = smov 4  }
  0x13   :  { %39 = dma.hbm_to_vmem [thread:$0]  %s808_s1, 2048, %s34_s28, [#allocation6], %s665_s15, %s665_s15, %s666_s16  }
  0x14   :  { %s667_s19 = smov [#allocation2]   ;;  %s668_s21 = smov [#allocation7]  }
  0x15   :  { %s24_s20 = sshll.u32 %s667_s19, 4  ;;  %s49_s22 = sshll.u32 %s668_s21, 4  ;;  %s25_s20 = int_to_ptr.vmem [resolvable:$true] %s24_s20  ;;  %s50_s22 = int_to_ptr.vmem [resolvable:$true] %s49_s22 }
  0x16   :  { %s568_s25 = scalar_lea.hbm %s807_s0, 128 }
  0x17   :  { %p569_p8 = scmp.ne.s32.totalorder %s807_s0, %s568_s25  ;;  %p572_p9 = scmp.lt.u32.totalorder %s568_s25, %s807_s0 }
  0x19   :  { %p574_p10 = pnand %p572_p9, %p569_p8 }
  0x1b   :  { %577 = shalt.err (!%p574_p10)
}
  0x1c   :  { %s578_s1 = scalar_lea.vmem %s25_s20, 128  ;;  %p583_p12 = scmp.lt.s32.totalorder %s25_s20, %s25_s20 }
  0x1d   :  { %p579_p11 = scmp.ne.s32.totalorder %s25_s20, %s578_s1  ;;  %p584_p13 = scmp.lt.s32.totalorder %s578_s1, %s578_s1 }
  0x1f   :  { %p585_p0 = por %p584_p13, %p583_p12 }
  0x21   :  { %p586_p1 = pnand %p585_p0, %p579_p11 }
  0x23   :  { %589 = shalt.err (!%p586_p1)
}
  0x24   :  { %27 = dma.hbm_to_vmem [thread:$0]  %s807_s0, 128, %s25_s20, [#allocation3]  }
  0x25   :  { %s590_s12 = scalar_lea.hbm %s811_s4, 1024 }
  0x26   :  { %p591_p2 = scmp.ne.s32.totalorder %s811_s4, %s590_s12  ;;  %p594_p3 = scmp.lt.u32.totalorder %s590_s12, %s811_s4 }
  0x28   :  { %p596_p4 = pnand %p594_p3, %p591_p2 }
  0x2a   :  { %599 = shalt.err (!%p596_p4)
}
  0x2b   :  { %s600_s19 = scalar_lea.vmem %s50_s22, 1024  ;;  %p605_p6 = scmp.lt.s32.totalorder %s50_s22, %s50_s22 }
  0x2c   :  { %p601_p5 = scmp.ne.s32.totalorder %s50_s22, %s600_s19  ;;  %p606_p7 = scmp.lt.s32.totalorder %s600_s19, %s600_s19 }
  0x2e   :  { %p607_p8 = por %p606_p7, %p605_p6 }
  0x30   :  { %p608_p9 = pnand %p607_p8, %p601_p5 }
  0x32   :  { %611 = shalt.err (!%p608_p9)
}
  0x33   :  { %55 = dma.hbm_to_vmem [thread:$0]  %s811_s4, 1024, %s50_s22, [#allocation6], %s665_s15, %s665_s15, %s666_s16  }
  0x34   :  { %656 = dma.done.wait [#allocation3], 128  }
  0x35   :  { %657 = vsyncadd [#allocation3], 4294967168 }
  0x36   :  { %658 = dma.done.wait [#allocation6], 3072  }
  0x37   :  { %659 = vsyncadd [#allocation6], 4294964224  ;;  %v512_v0 = vld [vmem:[#allocation5 + $0x40] sm:$0xff]   ;;  %v514_v2 = vld [vmem:[#allocation5 + $0x48] sm:$0xff]   ;;  %v669_v20 = vmov 0.0   ;;  %vm670_vm0 = vmmov 0  }
  0x38   :  { %v513_v1 = vld [vmem:[#allocation5] sm:$0xff]   ;;  %451 = vmatprep.subr.bf16.mxu0 %v512_v0  ;;  %v515_v3 = vld [vmem:[#allocation5 + $0x8] sm:$0xff]   ;;  %v516_v4 = vld [vmem:[#allocation5 + $0x50] sm:$0xff]   ;;  %482 = vmatprep.subr.bf16.mxu1 %v669_v20  ;;  %v671_v40 = vmov 1.0|1.0   ;;  %s673_s26 = smov [#allocation9]  }
  0x39   :  { %452 = vmatpush3.bf16.msra.mxu0 %v513_v1  ;;  %v517_v5 = vld [vmem:[#allocation5 + $0x10] sm:$0xff]   ;;  %v518_v6 = vld [vmem:[#allocation5 + $0x58] sm:$0xff]   ;;  %v520_v8 = vld [vmem:[#allocation5 + $0x60] sm:$0xff]   ;;  %498 = vmatprep.mubr.msk.bf16.mxu1 %vm670_vm0, %v669_v20  ;;  %s403_s27 = sshll.u32 %s673_s26, 4  ;;  %s404_s27 = int_to_ptr.vmem [resolvable:$true] %s403_s27 }
  0x3a   :  { %453 = vmatprep.subr.bf16.mxu0 %v514_v2  ;;  %v519_v7 = vld [vmem:[#allocation5 + $0x18] sm:$0xff]   ;;  %v521_v9 = vld [vmem:[#allocation5 + $0x20] sm:$0xff]   ;;  %v522_v10 = vld [vmem:[#allocation5 + $0x68] sm:$0xff]  }
  0x3b   :  { %v70_v11 = vld [vmem:[#allocation2] sm:$0xff]  ;;  %v523_v12 = vld [vmem:[#allocation5 + $0x28] sm:$0xff]   ;;  %v524_v14 = vld [vmem:[#allocation5 + $0x70] sm:$0xff]  }
  0x3c   :  { %v419_v13 = vcombine.high %v70_v11, %v70_v11  ;;  %v525_v15 = vld [vmem:[#allocation5 + $0x30] sm:$0xff]   ;;  %v526_v16 = vld [vmem:[#allocation5 + $0x78] sm:$0xff]   ;;  %v418_v18 = vcombine.low %v70_v11, %v70_v11  ;;  %v530_v19 = vld [vmem:[#allocation7] sm:$0xff]  }
  0x3d   :  { %454 = vmatpush3.bf16.msra.mxu0 %v515_v3  ;;  %v527_v17 = vld [vmem:[#allocation5 + $0x38] sm:$0xff]   ;;  %483 = vmatpush3.bf16.msra.mxu1 %v530_v19  ;;  %v531_v21 = vld [vmem:[#allocation7 + $0x8] sm:$0xff]   ;;  %v532_v22 = vld [vmem:[#allocation7 + $0x10] sm:$0xff]  }
  0x3e   :  { %455 = vmatprep.subr.bf16.mxu0 %v516_v4  ;;  %245 = vmatprep.mubr.bf16.mxu0 %v419_v13  ;;  %v533_v23 = vld [vmem:[#allocation7 + $0x18] sm:$0xff]   ;;  %v534_v24 = vld [vmem:[#allocation7 + $0x20] sm:$0xff]   ;;  %v535_v25 = vld [vmem:[#allocation7 + $0x28] sm:$0xff]  }
  0x3f   :  { %484 = vmatprep.subr.bf16.mxu1 %v669_v20  ;;  %v536_v26 = vld [vmem:[#allocation7 + $0x30] sm:$0xff]   ;;  %v537_v27 = vld [vmem:[#allocation7 + $0x38] sm:$0xff]  }
  0x40   :  { %v417_v29 = vld [vmem:[%s809_s2] ss:$0 sm:$0xff] }
  0x41   :  { %456 = vmatpush3.bf16.msra.mxu0 %v517_v5  ;;  %485 = vmatpush3.bf16.msra.mxu1 %v531_v21  ;;  %v259_v38 = vld [vmem:[%s810_s3] sm:$0xff]  ;;  %s672_s3 = smov [#allocation8]  }
  0x42   :  { %457 = vmatprep.subr.bf16.mxu0 %v518_v6  ;;  %486 = vmatprep.subr.bf16.mxu1 %v669_v20  ;;  %v438_v41 = vld [vmem:[%s812_s5] ss:$0 sm:$0xff]  ;;  %s393_s23 = sshll.u32 %s672_s3, 4  ;;  %s394_s23 = int_to_ptr.vmem [resolvable:$true] %s393_s23 }
  0x43   :  { %v381_v50 = vld [vmem:[%s813_s6] sm:$0xff]  ;;  %s612_s5 = scalar_lea.vmem %s394_s23, 128  ;;  %p617_p11 = scmp.lt.s32.totalorder %s394_s23, %s394_s23 }
  0x44   :  { %p613_p10 = scmp.ne.s32.totalorder %s394_s23, %s612_s5  ;;  %p618_p12 = scmp.lt.s32.totalorder %s612_s5, %s612_s5 }
  0x45   :  { %458 = vmatpush3.bf16.msra.mxu0 %v519_v7  ;;  %487 = vmatpush3.bf16.msra.mxu1 %v532_v22 }
  0x46   :  { %459 = vmatprep.subr.bf16.mxu0 %v520_v8  ;;  %488 = vmatprep.subr.bf16.mxu1 %v669_v20  ;;  %p619_p13 = por %p618_p12, %p617_p11 }
  0x48   :  { %p620_p0 = pnand %p619_p13, %p613_p10 }
  0x49   :  { %460 = vmatpush3.bf16.msra.mxu0 %v521_v9  ;;  %489 = vmatpush3.bf16.msra.mxu1 %v533_v23 }
  0x4a   :  { %461 = vmatprep.subr.bf16.mxu0 %v522_v10  ;;  %490 = vmatprep.subr.bf16.mxu1 %v669_v20 }
  0x4d   :  { %462 = vmatpush3.bf16.msra.mxu0 %v523_v12  ;;  %491 = vmatpush3.bf16.msra.mxu1 %v534_v24 }
  0x4e   :  { %463 = vmatprep.subr.bf16.mxu0 %v524_v14  ;;  %492 = vmatprep.subr.bf16.mxu1 %v669_v20 }
  0x51   :  { %464 = vmatpush3.bf16.msra.mxu0 %v525_v15  ;;  %493 = vmatpush3.bf16.msra.mxu1 %v535_v25 }
  0x52   :  { %465 = vmatprep.subr.bf16.mxu0 %v526_v16  ;;  %494 = vmatprep.subr.bf16.mxu1 %v669_v20 }
  0x55   :  { %466 = vmatpush3.bf16.msra.mxu0 %v527_v17  ;;  %495 = vmatpush3.bf16.msra.mxu1 %v536_v26 }
  0x56   :  { %496 = vmatprep.subr.bf16.mxu1 %v669_v20 }
  0x58   :  { %246 = vmatmul.mubr.bf16.vlgmr.msra.gmra.mrb[0].mxu0 %v418_v18 }
  0x59   :  { %497 = vmatpush3.bf16.msra.mxu1 %v537_v27 }
 0x12b   :  { %v467_v28 = vpop.f32.mrb[0].mxu0 }
 0x12c   :  { %v468_v30 = vpop.f32.mrb[1].mxu0 }
 0x12d   :  { %v469_v31 = vadd.f32 %v468_v30, %v467_v28  ;;  %v470_v32 = vpop.f32.mrb[2].mxu0 }
 0x12e   :  { %v471_v33 = vpop.f32.mrb[3].mxu0 }
 0x12f   :  { %v248_v34 = vadd.f32 %v469_v31, %v417_v29 }
 0x131   :  { %v436_v35 = vmul.f32 -1.442695, %v248_v34 }
 0x133   :  { %538 = vpow2.f32 %v436_v35 }
 0x13d   :  { %v539_v36 = vpop.eup %538 }
 0x13e   :  { %v256_v37 = vadd.f32 1.0, %v539_v36 }
 0x140   :  { %540 = vrcp.f32 %v256_v37 }
 0x14a   :  { %v541_v39 = vpop.eup %540 }
 0x14b   :  { %vm260_vm1 = vcmp.lt.f32.partialorder %v259_v38, %v541_v39 }
 0x14c   :  { %vm447_vm2 = vmpackc.low %vm260_vm1, %vm260_vm1 }
 0x14d   :  { %499 = vmatmul.mubr.msk.bf16.vlgmr.msra.gmra.mrb[0].mxu1 %vm447_vm2, %v671_v40 }
 0x220   :  { %v369_v42 = vpop.f32.mrb[0].mxu1 }
 0x221   :  { %v370_v43 = vadd.f32 %v438_v41, %v369_v42  ;;  %v500_v44 = vpop.f32.mrb[1].mxu1 }
 0x222   :  { %v372_v45 = vpop.f32.mrb[2].mxu1 }
 0x223   :  { %v449_v46 = vmul.f32 -1.442695, %v370_v43  ;;  %v501_v47 = vpop.f32.mrb[3].mxu1 }
 0x225   :  { %542 = vpow2.f32 %v449_v46 }
 0x22f   :  { %v543_v48 = vpop.eup %542 }
 0x230   :  { %v378_v49 = vadd.f32 1.0, %v543_v48 }
 0x232   :  { %544 = vrcp.f32 %v378_v49 }
 0x23c   :  { %v545_v51 = vpop.eup %544 }
 0x23d   :  { %383 = vst [vmem:[#allocation8] sm:$0xff] %v545_v51  ;;  %vm382_vm3 = vcmp.lt.f32.partialorder %v381_v50, %v545_v51 }
 0x23e   :  { %623 = shalt.err (!%p620_p0)
}
 0x23f   :  { %s624_s1 = scalar_lea.hbm %s814_s7, 128 }
 0x240   :  { %p625_p1 = scmp.ne.s32.totalorder %s814_s7, %s624_s1  ;;  %p628_p2 = scmp.lt.u32.totalorder %s624_s1, %s814_s7 }
 0x242   :  { %p630_p3 = pnand %p628_p2, %p625_p1 }
 0x244   :  { %633 = shalt.err (!%p630_p3)
}
 0x245   :  { %396 = dma.vmem_to_hbm [thread:$0]  %s394_s23, 128, %s814_s7, [#allocation4]   ;;  %v450_v52 = vsel %vm382_vm3, 1.0, %v669_v20 }
 0x246   :  { %386 = vst [vmem:[#allocation9] sm:$0xff] %v450_v52  ;;  %s634_s13 = scalar_lea.vmem %s404_s27, 128  ;;  %p639_p5 = scmp.lt.s32.totalorder %s404_s27, %s404_s27 }
 0x247   :  { %p635_p4 = scmp.ne.s32.totalorder %s404_s27, %s634_s13  ;;  %p640_p6 = scmp.lt.s32.totalorder %s634_s13, %s634_s13 }
 0x249   :  { %p641_p7 = por %p640_p6, %p639_p5 }
 0x24b   :  { %p642_p8 = pnand %p641_p7, %p635_p4 }
 0x24d   :  { %645 = shalt.err (!%p642_p8)
}
 0x24e   :  { %s646_s18 = scalar_lea.hbm %s815_s8, 128 }
 0x24f   :  { %p647_p9 = scmp.ne.s32.totalorder %s815_s8, %s646_s18  ;;  %p650_p10 = scmp.lt.u32.totalorder %s646_s18, %s815_s8 }
 0x251   :  { %p652_p11 = pnand %p650_p10, %p647_p9 }
 0x253   :  { %655 = shalt.err (!%p652_p11)
}
 0x254   :  { %406 = dma.vmem_to_hbm [thread:$0]  %s404_s27, 128, %s815_s8, [#allocation10]  }
 0x255   :  { %660 = dma.done.wait [#allocation4], 128  }
 0x256   :  { %661 = vsyncadd [#allocation4], 4294967168 }
 0x257   :  { %662 = dma.done.wait [#allocation10], 128  }
 0x258   :  { %663 = vsyncadd [#allocation10], 4294967168 }
 0x259   :  { %413 = vsyncpa [#allocation3], 1 }
 0x25a   :  { %414 = vsyncpa [#allocation6], 1 }
 0x25b   :  { %415 = vsyncpa [#allocation4], 1 }
 0x25c   :  { %416 = vsyncpa [#allocation10], 1 }

</bundles_post_ra>
